<compile_context>
chip_gen: v7x
topology: tpu7x:2x2x1
jax: 0.10.0
libtpu: 0.0.40
codegen_flags: <defaults>
</compile_context>

<pallas_src>
import functools

import jax
import jax.numpy as jnp
from jax.experimental import pallas as pl
from jax.experimental.pallas import tpu as pltpu

_EPS = 1e-5                       # PyTorch LayerNorm default eps
_VMEM_LIMIT = 32 * 1024 * 1024    # explicit scoped-VMEM cap (safe on v5e/v6e/v7x)


def _const_spec(shape, *, single_buffer=True):
    """Whole-array block, replicated across the grid.

    single_buffer=True requests Buffered(1) so grid-invariant operands are not
    double-buffered (halves weight VMEM footprint — matters at large C on v7x).
    Falls back to the default spec if this Pallas build lacks pipeline_mode.
    """
    index_map = lambda *_: (0,) * len(shape)
    if single_buffer:
        try:
            return pl.BlockSpec(shape, index_map, pipeline_mode=pl.Buffered(1))
        except Exception:  # pragma: no cover - older Pallas without pipeline_mode
            pass
    return pl.BlockSpec(shape, index_map)


# ---------------------------------------------------------------------------
# Kernel 1: default path (num_convs == 0):  token mean -> LayerNorm(C) -> fc
# One grid step per batch chunk of tb samples; the per-sample token mean is a
# block-diagonal pooling matmul so the whole chunk is a single MXU contraction.
# ---------------------------------------------------------------------------
def _reg_head_kernel(pool_ref, x_ref, g_ref, b_ref, w_ref, fb_ref, out_ref):
    f32 = jnp.float32
    # per-sample token mean via MXU: (tb, tb*N) @ (tb*N, C) -> (tb, C)
    m = jnp.dot(pool_ref[...], x_ref[...], preferred_element_type=f32)
    # norm_reg: LayerNorm over C (biased variance, eps inside rsqrt)
    mu = jnp.mean(m, axis=-1, keepdims=True)
    var = jnp.mean(jnp.square(m - mu), axis=-1, keepdims=True)
    mn = (m - mu) * jax.lax.rsqrt(var + _EPS) * g_ref[...] + b_ref[...]
    # fc_reg (output padded to a 128-lane slab; sliced in the wrapper)
    out_ref[...] = jnp.dot(mn, w_ref[...], preferred_element_type=f32) + fb_ref[...]


# ---------------------------------------------------------------------------
# Kernel 2: conv path (num_convs > 0), fused per batch chunk of tb samples:
#   num_convs x [ LayerNorm([C,H,W]); 3x3 valid conv via im2col; ReLU ]
#   -> token mean -> LayerNorm(C) -> fc
# Each conv layer is a single (tb*Ho*Wo, 9C) @ (9C, C) MXU matmul.
# ---------------------------------------------------------------------------
def _conv_reg_kernel(*refs, num_convs, feat_size):
    f32 = jnp.float32
    x_ref = refs[0]
    layer_refs = refs[1:1 + 4 * num_convs]
    reg_g_ref, reg_b_ref, fcw_ref, fcb_ref, out_ref = refs[1 + 4 * num_convs:]

    h = x_ref[...].astype(f32)          # (tb, H, W, C), channel-last
    tb = h.shape[0]
    C = h.shape[-1]
    H = feat_size                       # square feature map (H == W) assumed

    for i in range(num_convs):
        g_ref, be_ref, w_ref, cb_ref = layer_refs[4 * i: 4 * i + 4]

        # ---- LayerNorm over the whole (C, H, W) tensor of each sample -------
        # single vectorized whole-tensor reduce (lane -> sublane -> leading),
        # no per-row Python lists / per-row parameter slices.
        inv_n = 1.0 / (H * H * C)
        s = jnp.sum(h, axis=3, keepdims=True)        # (tb, H, W, 1)
        s = jnp.sum(s, axis=2, keepdims=True)        # (tb, H, 1, 1)
        s = jnp.sum(s, axis=1, keepdims=True)        # (tb, 1, 1, 1)
        mu = s * inv_n
        d = h - mu
        s2 = jnp.sum(jnp.square(d), axis=3, keepdims=True)
        s2 = jnp.sum(s2, axis=2, keepdims=True)
        s2 = jnp.sum(s2, axis=1, keepdims=True)
        inv = jax.lax.rsqrt(s2 * inv_n + _EPS)       # EUP rsqrt
        hn = d * inv * g_ref[...] + be_ref[...]      # g/b: (H, W, C), broadcast over tb

        # ---- Conv2d 3x3 (valid) as one im2col matmul per layer --------------
        Ho = H - 2                                   # square map -> Wo == Ho
        patches = jnp.concatenate(
            [hn[:, di:di + Ho, dj:dj + Ho, :] for di in range(3) for dj in range(3)],
            axis=-1)                                 # (tb, Ho, Ho, 9C)
        pm = patches.reshape(tb * Ho * Ho, 9 * C)    # M = tb*Ho*Wo
        y = jnp.dot(pm, w_ref[...], preferred_element_type=f32) + cb_ref[...]
        h = jnp.maximum(y, 0.0).reshape(tb, Ho, Ho, C)
        H = Ho

    # ---- tail: x.mean(dim=1) -> norm_reg -> fc_reg --------------------------
    m = jnp.sum(jnp.sum(h, axis=2), axis=1) * (1.0 / (H * H))   # (tb, C)
    mu = jnp.mean(m, axis=-1, keepdims=True)
    var = jnp.mean(jnp.square(m - mu), axis=-1, keepdims=True)
    mn = (m - mu) * jax.lax.rsqrt(var + _EPS) * reg_g_ref[...] + reg_b_ref[...]
    out_ref[...] = jnp.dot(mn, fcw_ref[...], preferred_element_type=f32) + fcb_ref[...]


# ---------------------------------------------------------------------------
# Wrapper
# ---------------------------------------------------------------------------
def layer_reg_forward(x, params, *, num_convs=0, feat_size=7, out_channels=2,
                      batch_block=8):
    B, N, C = x.shape
    OP = ((out_channels + 127) // 128) * 128          # lane-dense fc output slab

    fc_w = jnp.zeros((C, OP), x.dtype).at[:, :out_channels].set(params["fc_w"])
    fc_b = jnp.zeros((1, OP), x.dtype).at[:, :out_channels].set(params["fc_b"])

    tb = batch_block
    B_pad = ((B + tb - 1) // tb) * tb
    if B_pad != B:                                    # pad batch to a chunk multiple
        x = jnp.pad(x, ((0, B_pad - B), (0, 0), (0, 0)))

    compiler_params = pltpu.CompilerParams(
        dimension_semantics=("parallel",),            # splits chunks across v7x TCs
        vmem_limit_bytes=_VMEM_LIMIT)

    if num_convs == 0:
        # One reusable block-diagonal pool tile: pool[r, r*N + t] = 1/N.
        # Traffic is O(B*N*C); the chunk-sized pool tile (tb x tb*N) is tiny and
        # constant across the grid.  tb*N is a multiple of 8 (sublane-aligned);
        # lane padding of the pool to 128 is skipped since it is not the
        # bandwidth-dominant operand.
        pool = jnp.repeat(jnp.eye(tb, dtype=x.dtype), N, axis=1) * (1.0 / N)
        x2 = x.reshape(B_pad * N, C)
        out = pl.pallas_call(
            _reg_head_kernel,
            out_shape=jax.ShapeDtypeStruct((B_pad, OP), x.dtype),
            grid=(B_pad // tb,),
            in_specs=[
                _const_spec((tb, tb * N)),
                pl.BlockSpec((tb * N, C), lambda i: (i, 0)),
                _const_spec((1, C)), _const_spec((1, C)),
                _const_spec((C, OP)), _const_spec((1, OP)),
            ],
            out_specs=pl.BlockSpec((tb, OP), lambda i: (i, 0)),
            compiler_params=compiler_params,
        )(pool, x2, params["reg_g"], params["reg_b"], fc_w, fc_b)
        return out[:B, :out_channels]

    # ---- conv path: tb batch samples per grid step --------------------------
    assert N == feat_size * feat_size
    x4 = x.reshape(B_pad, feat_size, feat_size, C)    # channel-last view of (B,C,A,A)

    in_specs = [pl.BlockSpec((tb, feat_size, feat_size, C), lambda b: (b, 0, 0, 0))]
    args = [x4]
    for i in range(num_convs):
        Hi = feat_size - 2 * i
        in_specs += [_const_spec((Hi, Hi, C)), _const_spec((Hi, Hi, C)),
                     _const_spec((9 * C, C)), _const_spec((1, C))]
        args += [params["ln_g"][i], params["ln_b"][i],
                 params["conv_w"][i].reshape(9 * C, C),   # im2col weight (9C, Cout)
                 params["conv_b"][i]]
    in_specs += [_const_spec((1, C)), _const_spec((1, C)),
                 _const_spec((C, OP)), _const_spec((1, OP))]
    args += [params["reg_g"], params["reg_b"], fc_w, fc_b]

    kernel = functools.partial(_conv_reg_kernel, num_convs=num_convs,
                               feat_size=feat_size)
    out = pl.pallas_call(
        kernel,
        out_shape=jax.ShapeDtypeStruct((B_pad, OP), x.dtype),
        grid=(B_pad // tb,),
        in_specs=in_specs,
        out_specs=pl.BlockSpec((tb, OP), lambda b: (b, 0)),
        compiler_params=compiler_params,
    )(*args)
    return out[:B, :out_channels]


# ---------------------------------------------------------------------------
# Pure-JAX reference (same math, no Pallas)
# ---------------------------------------------------------------------------
def layer_reg_reference(x, params, *, num_convs=0, feat_size=7):
    with jax.default_matmul_precision("highest"):
        B, N, C = x.shape
        h = x
        if num_convs > 0:
            h = x.reshape(B, feat_size, feat_size, C)
            for i in range(num_convs):
                g, be = params["ln_g"][i], params["ln_b"][i]
                mu = jnp.mean(h, axis=(1, 2, 3), keepdims=True)
                var = jnp.mean(jnp.square(h - mu), axis=(1, 2, 3), keepdims=True)
                hn = (h - mu) / jnp.sqrt(var + _EPS) * g + be
                w = params["conv_w"][i].reshape(3, 3, C, C)          # HWIO
                conv = jax.lax.conv_general_dilated(
                    hn, w, window_strides=(1, 1), padding="VALID",
                    dimension_numbers=("NHWC", "HWIO", "NHWC"))
                h = jax.nn.relu(conv + params["conv_b"][i][0])
            h = h.reshape(B, -1, C)
        m = jnp.mean(h, axis=1)
        mu = jnp.mean(m, axis=-1, keepdims=True)
        var = jnp.mean(jnp.square(m - mu), axis=-1, keepdims=True)
        mn = (m - mu) / jnp.sqrt(var + _EPS) * params["reg_g"][0] + params["reg_b"][0]
        return mn @ params["fc_w"] + params["fc_b"][0]


# ---------------------------------------------------------------------------
if __name__ == "__main__":
    # ---- test 1: default config (in_channels=256, out_channels=2, num_convs=0, feat_size=7)
    B, C, A, OC = 2, 256, 7, 2
    N = A * A
    k = jax.random.split(jax.random.PRNGKey(0), 5)
    params0 = {
        "reg_g": 1.0 + 0.1 * jax.random.normal(k[0], (1, C), jnp.float32),
        "reg_b": 0.1 * jax.random.normal(k[1], (1, C), jnp.float32),
        "fc_w": 0.05 * jax.random.normal(k[2], (C, OC), jnp.float32),
        "fc_b": 0.05 * jax.random.normal(k[3], (1, OC), jnp.float32),
    }
    x0 = jax.random.normal(k[4], (B, N, C), jnp.float32)

    out0 = jax.block_until_ready(
        layer_reg_forward(x0, params0, num_convs=0, feat_size=A, out_channels=OC))
    ref0 = layer_reg_reference(x0, params0, num_convs=0, feat_size=A)
    assert out0.shape == (B, OC)
    assert jnp.allclose(out0, ref0, rtol=1e-2, atol=1e-2), \
        f"default path mismatch: max abs diff {jnp.max(jnp.abs(out0 - ref0))}"

    # ---- test 2: conv path (num_convs=2, in_channels=128, feat_size=7, out_channels=2)
    B2, C2, A2, NC2, OC2 = 2, 128, 7, 2, 2
    k2 = jax.random.split(jax.random.PRNGKey(1), 4 * NC2 + 5)
    params1 = {
        "ln_g": [1.0 + 0.1 * jax.random.normal(
            k2[4 * i + 0], (A2 - 2 * i, A2 - 2 * i, C2), jnp.float32) for i in range(NC2)],
        "ln_b": [0.1 * jax.random.normal(
            k2[4 * i + 1], (A2 - 2 * i, A2 - 2 * i, C2), jnp.float32) for i in range(NC2)],
        "conv_w": [0.02 * jax.random.normal(
            k2[4 * i + 2], (9, C2, C2), jnp.float32) for i in range(NC2)],
        "conv_b": [0.1 * jax.random.normal(
            k2[4 * i + 3], (1, C2), jnp.float32) for i in range(NC2)],
        "reg_g": 1.0 + 0.1 * jax.random.normal(k2[4 * NC2 + 0], (1, C2), jnp.float32),
        "reg_b": 0.1 * jax.random.normal(k2[4 * NC2 + 1], (1, C2), jnp.float32),
        "fc_w": 0.05 * jax.random.normal(k2[4 * NC2 + 2], (C2, OC2), jnp.float32),
        "fc_b": 0.05 * jax.random.normal(k2[4 * NC2 + 3], (1, OC2), jnp.float32),
    }
    x1 = jax.random.normal(k2[4 * NC2 + 4], (B2, A2 * A2, C2), jnp.float32)

    out1 = jax.block_until_ready(
        layer_reg_forward(x1, params1, num_convs=NC2, feat_size=A2, out_channels=OC2))
    ref1 = layer_reg_reference(x1, params1, num_convs=NC2, feat_size=A2)
    assert out1.shape == (B2, OC2)
    assert jnp.allclose(out1, ref1, rtol=1e-2, atol=1e-2), \
        f"conv path mismatch: max abs diff {jnp.max(jnp.abs(out1 - ref1))}"

    print("KERNEL_OK")
</pallas_src>

<mosaic_0001>
module attributes {stable_mosaic.version = 11 : i64} {
  func.func @_reg_head_kernel(%arg0: i32, %arg1: memref<8x392xf32, #tpu.memory_space<vmem>>, %arg2: memref<392x256xf32, #tpu.memory_space<vmem>>, %arg3: memref<1x256xf32, #tpu.memory_space<vmem>>, %arg4: memref<1x256xf32, #tpu.memory_space<vmem>>, %arg5: memref<256x128xf32, #tpu.memory_space<vmem>>, %arg6: memref<1x128xf32, #tpu.memory_space<vmem>>, %arg7: memref<8x128xf32, #tpu.memory_space<vmem>>) attributes {dimension_semantics = [#tpu.dimension_semantics<parallel>], iteration_bounds = array<i64: 1>, scalar_prefetch = 0 : i64, scratch_operands = 0 : i64, tpu.core_type = #tpu.core_type<tc>, window_params = [{pipeline_mode = #tpu.pipeline_mode<synchronous>, transform_indices = @transform_0, window_bounds = array<i64: 8, 392>}, {transform_indices = @transform_1, window_bounds = array<i64: 392, 256>}, {pipeline_mode = #tpu.pipeline_mode<synchronous>, transform_indices = @transform_2, window_bounds = array<i64: 1, 256>}, {pipeline_mode = #tpu.pipeline_mode<synchronous>, transform_indices = @transform_3, window_bounds = array<i64: 1, 256>}, {pipeline_mode = #tpu.pipeline_mode<synchronous>, transform_indices = @transform_4, window_bounds = array<i64: 256, 128>}, {pipeline_mode = #tpu.pipeline_mode<synchronous>, transform_indices = @transform_5, window_bounds = array<i64: 1, 128>}, {transform_indices = @transform_6, window_bounds = array<i64: 8, 128>}]} {
    %c0 = arith.constant 0 : index
    %c0_0 = arith.constant 0 : index
    %0 = vector.load %arg1[%c0, %c0_0] : memref<8x392xf32, #tpu.memory_space<vmem>>, vector<8x392xf32>
    %c0_1 = arith.constant 0 : index
    %c0_2 = arith.constant 0 : index
    %1 = vector.load %arg2[%c0_1, %c0_2] : memref<392x256xf32, #tpu.memory_space<vmem>>, vector<392x256xf32>
    %cst = arith.constant dense<0.000000e+00> : vector<8x256xf32>
    %2 = tpu.matmul %0, %1, %cst {dimension_numbers = #tpu.dot_dimension_numbers<[1], [0], [0], [1], [0, 0, 1, 1], [], []>} : vector<8x392xf32>, vector<392x256xf32>, vector<8x256xf32> -> vector<8x256xf32>
    %cst_3 = arith.constant dense<0.000000e+00> : vector<8xf32>
    %3 = vector.multi_reduction <add>, %2, %cst_3 [1] : vector<8x256xf32> to vector<8xf32>
    %4 = vector.shape_cast %3 : vector<8xf32> to vector<8x1xf32>
    %cst_4 = arith.constant 2.560000e+02 : f32
    %5 = vector.broadcast %cst_4 : f32 to vector<8x1xf32>
    %6 = arith.divf %4, %5 : vector<8x1xf32>
    %7 = vector.broadcast %6 : vector<8x1xf32> to vector<8x256xf32>
    %8 = arith.subf %2, %7 : vector<8x256xf32>
    %9 = arith.mulf %8, %8 : vector<8x256xf32>
    %cst_5 = arith.constant dense<0.000000e+00> : vector<8xf32>
    %10 = vector.multi_reduction <add>, %9, %cst_5 [1] : vector<8x256xf32> to vector<8xf32>
    %11 = vector.shape_cast %10 : vector<8xf32> to vector<8x1xf32>
    %cst_6 = arith.constant 2.560000e+02 : f32
    %12 = vector.broadcast %cst_6 : f32 to vector<8x1xf32>
    %13 = arith.divf %11, %12 : vector<8x1xf32>
    %14 = vector.broadcast %6 : vector<8x1xf32> to vector<8x256xf32>
    %15 = arith.subf %2, %14 : vector<8x256xf32>
    %cst_7 = arith.constant 9.99999974E-6 : f32
    %16 = vector.broadcast %cst_7 : f32 to vector<8x1xf32>
    %17 = arith.addf %13, %16 : vector<8x1xf32>
    %18 = math.rsqrt %17 : vector<8x1xf32>
    %19 = vector.broadcast %18 : vector<8x1xf32> to vector<8x256xf32>
    %20 = arith.mulf %15, %19 : vector<8x256xf32>
    %c0_8 = arith.constant 0 : index
    %c0_9 = arith.constant 0 : index
    %21 = vector.load %arg3[%c0_8, %c0_9] : memref<1x256xf32, #tpu.memory_space<vmem>>, vector<1x256xf32>
    %22 = vector.broadcast %21 : vector<1x256xf32> to vector<8x256xf32>
    %23 = arith.mulf %20, %22 : vector<8x256xf32>
    %c0_10 = arith.constant 0 : index
    %c0_11 = arith.constant 0 : index
    %24 = vector.load %arg4[%c0_10, %c0_11] : memref<1x256xf32, #tpu.memory_space<vmem>>, vector<1x256xf32>
    %25 = vector.broadcast %24 : vector<1x256xf32> to vector<8x256xf32>
    %26 = arith.addf %23, %25 : vector<8x256xf32>
    %c0_12 = arith.constant 0 : index
    %c0_13 = arith.constant 0 : index
    %27 = vector.load %arg5[%c0_12, %c0_13] : memref<256x128xf32, #tpu.memory_space<vmem>>, vector<256x128xf32>
    %cst_14 = arith.constant dense<0.000000e+00> : vector<8x128xf32>
    %28 = tpu.matmul %26, %27, %cst_14 {dimension_numbers = #tpu.dot_dimension_numbers<[1], [0], [0], [1], [0, 0, 1, 1], [], []>} : vector<8x256xf32>, vector<256x128xf32>, vector<8x128xf32> -> vector<8x128xf32>
    %c0_15 = arith.constant 0 : index
    %c0_16 = arith.constant 0 : index
    %29 = vector.load %arg6[%c0_15, %c0_16] : memref<1x128xf32, #tpu.memory_space<vmem>>, vector<1x128xf32>
    %30 = vector.broadcast %29 : vector<1x128xf32> to vector<8x128xf32>
    %31 = arith.addf %28, %30 : vector<8x128xf32>
    %c0_17 = arith.constant 0 : index
    %c0_18 = arith.constant 0 : index
    %32 = vector.load %arg7[%c0_17, %c0_18] : memref<8x128xf32, #tpu.memory_space<vmem>>, vector<8x128xf32>
    tpu.vector_store %arg7[%c0_17, %c0_18], %31 {strides = array<i32>} : memref<8x128xf32, #tpu.memory_space<vmem>>, vector<8x128xf32>,
    return
  }
  func.func @transform_0(%arg0: i32) -> (i32, i32) {
    %c0_i32 = arith.constant 0 : i32
    %c0_i32_0 = arith.constant 0 : i32
    %c0_i32_1 = arith.constant 0 : i32
    return %c0_i32, %c0_i32_0 : i32, i32
  }
  func.func @transform_1(%arg0: i32) -> (i32, i32) {
    %c0_i32 = arith.constant 0 : i32
    %c0_i32_0 = arith.constant 0 : i32
    return %arg0, %c0_i32 : i32, i32
  }
  func.func @transform_2(%arg0: i32) -> (i32, i32) {
    %c0_i32 = arith.constant 0 : i32
    %c0_i32_0 = arith.constant 0 : i32
    %c0_i32_1 = arith.constant 0 : i32
    return %c0_i32, %c0_i32_0 : i32, i32
  }
  func.func @transform_3(%arg0: i32) -> (i32, i32) {
    %c0_i32 = arith.constant 0 : i32
    %c0_i32_0 = arith.constant 0 : i32
    %c0_i32_1 = arith.constant 0 : i32
    return %c0_i32, %c0_i32_0 : i32, i32
  }
  func.func @transform_4(%arg0: i32) -> (i32, i32) {
    %c0_i32 = arith.constant 0 : i32
    %c0_i32_0 = arith.constant 0 : i32
    %c0_i32_1 = arith.constant 0 : i32
    return %c0_i32, %c0_i32_0 : i32, i32
  }
  func.func @transform_5(%arg0: i32) -> (i32, i32) {
    %c0_i32 = arith.constant 0 : i32
    %c0_i32_0 = arith.constant 0 : i32
    %c0_i32_1 = arith.constant 0 : i32
    return %c0_i32, %c0_i32_0 : i32, i32
  }
  func.func @transform_6(%arg0: i32) -> (i32, i32) {
    %c0_i32 = arith.constant 0 : i32
    %c0_i32_0 = arith.constant 0 : i32
    return %arg0, %c0_i32 : i32, i32
  }
}

</mosaic_0001>

<bundles_post_ra>
// kernel: tpu_custom_call.1
= control target key start
LH: loop header
LB: loop body
LE: loop exit
PB: predicated region body
PF: predicated region fallthrough
CT: control target
= control target key end

     0   :  { %11 = vsyncpa [#allocation3], 0  ;;  %s854_s0 = inlined_call_operand.hbm [shape: f32[8,392], index: 0, kind: input, shape index: {}]   ;;  %s855_s1 = inlined_call_operand.hbm [shape: f32[392,256], index: 1, kind: input, shape index: {}]   ;;  %s856_s2 = inlined_call_operand.vmem [shape: f32[1,256], index: 2, kind: input, shape index: {}]   ;;  %s857_s3 = inlined_call_operand.vmem [shape: f32[1,256], index: 3, kind: input, shape index: {}]   ;;  %s858_s4 = inlined_call_operand.hbm [shape: f32[256,128], index: 4, kind: input, shape index: {}]   ;;  %s859_s5 = inlined_call_operand.vmem [shape: f32[1,128], index: 5, kind: input, shape index: {}]   ;;  %s860_s6 = inlined_call_operand.hbm [shape: f32[8,128], index: 6, kind: output, shape index: {}]  }
   0x1   :  { %12 = vsyncpa [#allocation6], 0 }
   0x2   :  { %13 = vsyncpa [#allocation4], 0  ;;  %s753_s21 = smov [#allocation5]   ;;  %s659_s25 = scalar_lea.hbm %s855_s1, 12544 }
   0x3   :  { %s29_s22 = sshll.u32 %s753_s21, 4  ;;  %p660_p0 = scmp.ne.s32.totalorder %s855_s1, %s659_s25  ;;  %s30_s22 = int_to_ptr.vmem [resolvable:$true] %s29_s22 }
   0x4   :  { %p663_p1 = scmp.lt.u32.totalorder %s659_s25, %s855_s1 }
   0x6   :  { %p665_p2 = pnand %p663_p1, %p660_p0 }
   0x8   :  { %668 = shalt.err (!%p665_p2)
}
   0x9   :  { %s669_s30 = scalar_lea.vmem %s30_s22, 12544  ;;  %p674_p4 = scmp.lt.s32.totalorder %s30_s22, %s30_s22 }
   0xa   :  { %p670_p3 = scmp.ne.s32.totalorder %s30_s22, %s669_s30  ;;  %p675_p5 = scmp.lt.s32.totalorder %s669_s30, %s669_s30 }
   0xc   :  { %p676_p6 = por %p675_p5, %p674_p4 }
   0xe   :  { %p677_p7 = pnand %p676_p6, %p670_p3 }
  0x10   :  { %680 = shalt.err (!%p677_p7)
}
  0x11   :  { %s754_s7 = smov 256   ;;  %s755_s8 = smov 16  }
  0x12   :  { %35 = dma.hbm_to_vmem [thread:$0]  %s855_s1, 12544, %s30_s22, [#allocation6], %s754_s7, %s754_s7, %s755_s8  }
  0x13   :  { %s756_s11 = smov [#allocation2]   ;;  %s757_s13 = smov [#allocation7]  }
  0x14   :  { %s20_s12 = sshll.u32 %s756_s11, 4  ;;  %s45_s14 = sshll.u32 %s757_s13, 4  ;;  %s21_s12 = int_to_ptr.vmem [resolvable:$true] %s20_s12  ;;  %s46_s14 = int_to_ptr.vmem [resolvable:$true] %s45_s14 }
  0x15   :  { %s681_s17 = scalar_lea.hbm %s854_s0, 512 }
  0x16   :  { %p682_p8 = scmp.ne.s32.totalorder %s854_s0, %s681_s17  ;;  %p685_p9 = scmp.lt.u32.totalorder %s681_s17, %s854_s0 }
  0x18   :  { %p687_p10 = pnand %p685_p9, %p682_p8 }
  0x1a   :  { %690 = shalt.err (!%p687_p10)
}
  0x1b   :  { %s691_s1 = scalar_lea.vmem %s21_s12, 512  ;;  %p696_p12 = scmp.lt.s32.totalorder %s21_s12, %s21_s12 }
  0x1c   :  { %p692_p11 = scmp.ne.s32.totalorder %s21_s12, %s691_s1  ;;  %p697_p13 = scmp.lt.s32.totalorder %s691_s1, %s691_s1 }
  0x1e   :  { %p698_p0 = por %p697_p13, %p696_p12 }
  0x20   :  { %p699_p1 = pnand %p698_p0, %p692_p11 }
  0x22   :  { %702 = shalt.err (!%p699_p1)
}
  0x23   :  { %23 = dma.hbm_to_vmem [thread:$0]  %s854_s0, 512, %s21_s12, [#allocation3]  }
  0x24   :  { %s703_s26 = scalar_lea.hbm %s858_s4, 4096 }
  0x25   :  { %p704_p2 = scmp.ne.s32.totalorder %s858_s4, %s703_s26  ;;  %p707_p3 = scmp.lt.u32.totalorder %s703_s26, %s858_s4 }
  0x27   :  { %p709_p4 = pnand %p707_p3, %p704_p2 }
  0x29   :  { %712 = shalt.err (!%p709_p4)
}
  0x2a   :  { %s713_s7 = scalar_lea.vmem %s46_s14, 4096  ;;  %p718_p6 = scmp.lt.s32.totalorder %s46_s14, %s46_s14 }
  0x2b   :  { %p714_p5 = scmp.ne.s32.totalorder %s46_s14, %s713_s7  ;;  %p719_p7 = scmp.lt.s32.totalorder %s713_s7, %s713_s7 }
  0x2d   :  { %p720_p8 = por %p719_p7, %p718_p6 }
  0x2f   :  { %p721_p9 = pnand %p720_p8, %p714_p5 }
  0x31   :  { %724 = shalt.err (!%p721_p9)
}
  0x32   :  { %s758_s0 = smov 128   ;;  %s759_s8 = smov 8  }
  0x33   :  { %51 = dma.hbm_to_vmem [thread:$0]  %s858_s4, 4096, %s46_s14, [#allocation6], %s758_s0, %s758_s0, %s759_s8  }
  0x34   :  { %747 = dma.done.wait [#allocation3], 512  }
  0x35   :  { %748 = vsyncadd [#allocation3], 4294966784 }
  0x36   :  { %749 = dma.done.wait [#allocation6], 16640  }
  0x37   :  { %750 = vsyncadd [#allocation6], 4294950656  ;;  %v68_v0 = vld [vmem:[#allocation5 + $0x8] sm:$0xff]  ;;  %v70_v1 = vld [vmem:[#allocation5 + $0x18] sm:$0xff]  ;;  %vm165_vm0 = vcmask 64512  }
  0x38   :  { %v67_v2 = vld [vmem:[#allocation5] sm:$0xff]  ;;  %v519_v3 = vpack.c.bf16 %v70_v1, %v68_v0  ;;  %v69_v4 = vld [vmem:[#allocation5 + $0x10] sm:$0xff]  ;;  %v72_v5 = vld [vmem:[#allocation5 + $0x28] sm:$0xff] }
  0x39   :  { %v74_v6 = vld [vmem:[#allocation5 + $0x38] sm:$0xff]  ;;  %v521_v7 = vpack.c.bf16 %v69_v4, %v67_v2  ;;  %v71_v9 = vld [vmem:[#allocation5 + $0x20] sm:$0xff]  ;;  %v73_v10 = vld [vmem:[#allocation5 + $0x30] sm:$0xff] }
  0x3a   :  { %v523_v8 = vpack.c.bf16 %v74_v6, %v72_v5  ;;  %v76_v11 = vld [vmem:[#allocation5 + $0x48] sm:$0xff]  ;;  %520 = vmatprep.subr.bf16.mxu0 %v519_v3  ;;  %v78_v12 = vld [vmem:[#allocation5 + $0x58] sm:$0xff]  ;;  %v525_v13 = vpack.c.bf16 %v73_v10, %v71_v9  ;;  %v75_v15 = vld [vmem:[#allocation5 + $0x40] sm:$0xff] }
  0x3b   :  { %522 = vmatpush1.bf16.msra.mxu0 %v521_v7  ;;  %v527_v14 = vpack.c.bf16 %v78_v12, %v76_v11  ;;  %v77_v16 = vld [vmem:[#allocation5 + $0x50] sm:$0xff]  ;;  %v80_v17 = vld [vmem:[#allocation5 + $0x68] sm:$0xff]  ;;  %v82_v18 = vld [vmem:[#allocation5 + $0x78] sm:$0xff] }
  0x3c   :  { %524 = vmatprep.subr.bf16.mxu0 %v523_v8  ;;  %v529_v19 = vpack.c.bf16 %v77_v16, %v75_v15  ;;  %v531_v20 = vpack.c.bf16 %v82_v18, %v80_v17  ;;  %v79_v21 = vld [vmem:[#allocation5 + $0x60] sm:$0xff]  ;;  %v81_v22 = vld [vmem:[#allocation5 + $0x70] sm:$0xff]  ;;  %v84_v23 = vld [vmem:[#allocation5 + $0x88] sm:$0xff] }
  0x3d   :  { %v86_v24 = vld [vmem:[#allocation5 + $0x98] sm:$0xff]  ;;  %v132_v25 = vld [vmem:[#allocation5 + $0x208] sm:$0xff]  ;;  %v131_v27 = vld [vmem:[#allocation5 + $0x200] sm:$0xff]  ;;  %v533_v29 = vpack.c.bf16 %v81_v22, %v79_v21 }
  0x3e   :  { %v134_v26 = vld [vmem:[#allocation5 + $0x218] sm:$0xff]  ;;  %v133_v28 = vld [vmem:[#allocation5 + $0x210] sm:$0xff]  ;;  %v83_v30 = vld [vmem:[#allocation5 + $0x80] sm:$0xff]  ;;  %v535_v34 = vpack.c.bf16 %v86_v24, %v84_v23 }
  0x3f   :  { %526 = vmatpush1.bf16.msra.mxu0 %v525_v13  ;;  %v85_v31 = vld [vmem:[#allocation5 + $0x90] sm:$0xff]  ;;  %v583_v32 = vpack.c.bf16 %v134_v26, %v132_v25  ;;  %v585_v33 = vpack.c.bf16 %v133_v28, %v131_v27  ;;  %v88_v35 = vld [vmem:[#allocation5 + $0xa8] sm:$0xff]  ;;  %v138_v37 = vld [vmem:[#allocation5 + $0x238] sm:$0xff] }
  0x40   :  { %528 = vmatprep.subr.bf16.mxu0 %v527_v14  ;;  %v136_v36 = vld [vmem:[#allocation5 + $0x228] sm:$0xff]  ;;  %v90_v38 = vld [vmem:[#allocation5 + $0xb8] sm:$0xff]  ;;  %v135_v40 = vld [vmem:[#allocation5 + $0x220] sm:$0xff]  ;;  %v537_v43 = vpack.c.bf16 %v85_v31, %v83_v30 }
  0x41   :  { %584 = vmatprep.subr.bf16.mxu1 %v583_v32  ;;  %v587_v39 = vpack.c.bf16 %v138_v37, %v136_v36  ;;  %v137_v41 = vld [vmem:[#allocation5 + $0x230] sm:$0xff]  ;;  %v140_v44 = vld [vmem:[#allocation5 + $0x248] sm:$0xff]  ;;  %v142_v45 = vld [vmem:[#allocation5 + $0x258] sm:$0xff]  ;;  %v539_v47 = vpack.c.bf16 %v90_v38, %v88_v35 }
  0x42   :  { %586 = vmatpush1.bf16.msra.mxu1 %v585_v33  ;;  %v589_v42 = vpack.c.bf16 %v137_v41, %v135_v40  ;;  %v139_v46 = vld [vmem:[#allocation5 + $0x240] sm:$0xff]  ;;  %v89_v49 = vld [vmem:[#allocation5 + $0xb0] sm:$0xff]  ;;  %v591_v50 = vpack.c.bf16 %v142_v45, %v140_v44  ;;  %v92_v52 = vld [vmem:[#allocation5 + $0xc8] sm:$0xff] }
  0x43   :  { %530 = vmatpush1.bf16.msra.mxu0 %v529_v19  ;;  %588 = vmatprep.subr.bf16.mxu1 %v587_v39  ;;  %v87_v48 = vld [vmem:[#allocation5 + $0xa0] sm:$0xff]  ;;  %v141_v51 = vld [vmem:[#allocation5 + $0x250] sm:$0xff]  ;;  %v94_v53 = vld [vmem:[#allocation5 + $0xd8] sm:$0xff] }
  0x44   :  { %532 = vmatprep.subr.bf16.mxu0 %v531_v20  ;;  %v144_v54 = vld [vmem:[#allocation5 + $0x268] sm:$0xff]  ;;  %v593_v55 = vpack.c.bf16 %v141_v51, %v139_v46  ;;  %v146_v56 = vld [vmem:[#allocation5 + $0x278] sm:$0xff]  ;;  %v541_v57 = vpack.c.bf16 %v89_v49, %v87_v48  ;;  %v91_v58 = vld [vmem:[#allocation5 + $0xc0] sm:$0xff]  ;;  %v543_v62 = vpack.c.bf16 %v94_v53, %v92_v52 }
  0x45   :  { %v595_v59 = vpack.c.bf16 %v146_v56, %v144_v54  ;;  %v143_v60 = vld [vmem:[#allocation5 + $0x260] sm:$0xff]  ;;  %v145_v61 = vld [vmem:[#allocation5 + $0x270] sm:$0xff]  ;;  %v148_v0 = vld [vmem:[#allocation5 + $0x288] sm:$0xff] }
  0x46   :  { %590 = vmatpush1.bf16.msra.mxu1 %v589_v42  ;;  %v93_v63 = vld [vmem:[#allocation5 + $0xd0] sm:$0xff]  ;;  %v150_v1 = vld [vmem:[#allocation5 + $0x298] sm:$0xff]  ;;  %v96_v2 = vld [vmem:[#allocation5 + $0xe8] sm:$0xff]  ;;  %v597_v4 = vpack.c.bf16 %v145_v61, %v143_v60 }
  0x47   :  { %534 = vmatpush1.bf16.msra.mxu0 %v533_v29  ;;  %592 = vmatprep.subr.bf16.mxu1 %v591_v50  ;;  %v98_v3 = vld [vmem:[#allocation5 + $0xf8] sm:$0xff]  ;;  %v545_v5 = vpack.c.bf16 %v93_v63, %v91_v58  ;;  %v95_v6 = vld [vmem:[#allocation5 + $0xe0] sm:$0xff]  ;;  %v599_v7 = vpack.c.bf16 %v150_v1, %v148_v0  ;;  %v149_v9 = vld [vmem:[#allocation5 + $0x290] sm:$0xff] }
  0x48   :  { %536 = vmatprep.subr.bf16.mxu0 %v535_v34  ;;  %v147_v8 = vld [vmem:[#allocation5 + $0x280] sm:$0xff]  ;;  %v547_v10 = vpack.c.bf16 %v98_v3, %v96_v2  ;;  %v97_v11 = vld [vmem:[#allocation5 + $0xf0] sm:$0xff]  ;;  %v152_v12 = vld [vmem:[#allocation5 + $0x2a8] sm:$0xff] }
  0x49   :  { %v154_v13 = vld [vmem:[#allocation5 + $0x2b8] sm:$0xff]  ;;  %v100_v14 = vld [vmem:[#allocation5 + $0x108] sm:$0xff]  ;;  %v601_v16 = vpack.c.bf16 %v149_v9, %v147_v8  ;;  %v549_v17 = vpack.c.bf16 %v97_v11, %v95_v6  ;;  %v99_v18 = vld [vmem:[#allocation5 + $0x100] sm:$0xff] }
  0x4a   :  { %594 = vmatpush1.bf16.msra.mxu1 %v593_v55  ;;  %v102_v15 = vld [vmem:[#allocation5 + $0x118] sm:$0xff]  ;;  %v603_v19 = vpack.c.bf16 %v154_v13, %v152_v12  ;;  %v151_v20 = vld [vmem:[#allocation5 + $0x2a0] sm:$0xff]  ;;  %v153_v21 = vld [vmem:[#allocation5 + $0x2b0] sm:$0xff] }
  0x4b   :  { %538 = vmatpush1.bf16.msra.mxu0 %v537_v43  ;;  %596 = vmatprep.subr.bf16.mxu1 %v595_v59  ;;  %v551_v22 = vpack.c.bf16 %v102_v15, %v100_v14  ;;  %v101_v23 = vld [vmem:[#allocation5 + $0x110] sm:$0xff]  ;;  %v156_v24 = vld [vmem:[#allocation5 + $0x2c8] sm:$0xff]  ;;  %v158_v25 = vld [vmem:[#allocation5 + $0x2d8] sm:$0xff]  ;;  %v605_v30 = vpack.c.bf16 %v153_v21, %v151_v20 }
  0x4c   :  { %540 = vmatprep.subr.bf16.mxu0 %v539_v47  ;;  %v104_v26 = vld [vmem:[#allocation5 + $0x128] sm:$0xff]  ;;  %v106_v27 = vld [vmem:[#allocation5 + $0x138] sm:$0xff]  ;;  %v103_v28 = vld [vmem:[#allocation5 + $0x120] sm:$0xff]  ;;  %v553_v31 = vpack.c.bf16 %v101_v23, %v99_v18  ;;  %v607_v32 = vpack.c.bf16 %v158_v25, %v156_v24 }
  0x4d   :  { %v105_v29 = vld [vmem:[#allocation5 + $0x130] sm:$0xff]  ;;  %v155_v33 = vld [vmem:[#allocation5 + $0x2c0] sm:$0xff]  ;;  %v66_v35 = vld [vmem:[#allocation2 + $0x18] sm:$0xff]  ;;  %v555_v36 = vpack.c.bf16 %v106_v27, %v104_v26 }
  0x4e   :  { %598 = vmatpush1.bf16.msra.mxu1 %v597_v4  ;;  %v157_v34 = vld [vmem:[#allocation5 + $0x2d0] sm:$0xff]  ;;  %v160_v37 = vld [vmem:[#allocation5 + $0x2e8] sm:$0xff]  ;;  %v162_v38 = vld [vmem:[#allocation5 + $0x2f8] sm:$0xff]  ;;  %482 = vmatprep.mubr.msk.f32.mxu1 %vm165_vm0, %v66_v35  ;;  %v557_v43 = vpack.c.bf16 %v105_v29, %v103_v28 }
  0x4f   :  { %542 = vmatpush1.bf16.msra.mxu0 %v541_v57  ;;  %600 = vmatprep.subr.bf16.mxu1 %v599_v7  ;;  %v64_v39 = vld [vmem:[#allocation2 + $0x8] sm:$0xff]  ;;  %v110_v41 = vld [vmem:[#allocation5 + $0x158] sm:$0xff]  ;;  %v609_v42 = vpack.c.bf16 %v157_v34, %v155_v33  ;;  %v611_v44 = vpack.c.bf16 %v162_v38, %v160_v37  ;;  %v159_v45 = vld [vmem:[#allocation5 + $0x2e0] sm:$0xff] }
  0x50   :  { %544 = vmatprep.subr.bf16.mxu0 %v543_v62  ;;  %v108_v40 = vld [vmem:[#allocation5 + $0x148] sm:$0xff]  ;;  %233 = vmatprep.mubr.f32.mxu0 %v64_v39  ;;  %v161_v46 = vld [vmem:[#allocation5 + $0x2f0] sm:$0xff]  ;;  %v107_v48 = vld [vmem:[#allocation5 + $0x140] sm:$0xff] }
  0x51   :  { %v559_v47 = vpack.c.bf16 %v110_v41, %v108_v40  ;;  %v109_v49 = vld [vmem:[#allocation5 + $0x150] sm:$0xff]  ;;  %v112_v50 = vld [vmem:[#allocation5 + $0x168] sm:$0xff]  ;;  %v114_v51 = vld [vmem:[#allocation5 + $0x178] sm:$0xff]  ;;  %v613_v52 = vpack.c.bf16 %v161_v46, %v159_v45 }
  0x52   :  { %602 = vmatpush1.bf16.msra.mxu1 %v601_v16  ;;  %v561_v53 = vpack.c.bf16 %v109_v49, %v107_v48  ;;  %v563_v54 = vpack.c.bf16 %v114_v51, %v112_v50  ;;  %v111_v55 = vld [vmem:[#allocation5 + $0x160] sm:$0xff]  ;;  %v113_v56 = vld [vmem:[#allocation5 + $0x170] sm:$0xff]  ;;  %v164_v57 = vld [vmem:[#allocation5 + $0x308] sm:$0xff] }
  0x53   :  { %546 = vmatpush1.bf16.msra.mxu0 %v545_v5  ;;  %604 = vmatprep.subr.bf16.mxu1 %v603_v19  ;;  %v116_v58 = vld [vmem:[#allocation5 + $0x188] sm:$0xff]  ;;  %v118_v59 = vld [vmem:[#allocation5 + $0x198] sm:$0xff]  ;;  %v565_v60 = vpack.c.bf16 %v113_v56, %v111_v55  ;;  %v163_v61 = vld [vmem:[#allocation5 + $0x300] sm:$0xff] }
  0x54   :  { %548 = vmatprep.subr.bf16.mxu0 %v547_v10  ;;  %v567_v62 = vpack.c.bf16 %v118_v59, %v116_v58  ;;  %v115_v63 = vld [vmem:[#allocation5 + $0x180] sm:$0xff]  ;;  %v117_v0 = vld [vmem:[#allocation5 + $0x190] sm:$0xff]  ;;  %v120_v2 = vld [vmem:[#allocation5 + $0x1a8] sm:$0xff] }
  0x55   :  { %v65_v1 = vld [vmem:[#allocation2 + $0x10] sm:$0xff]  ;;  %v122_v3 = vld [vmem:[#allocation5 + $0x1b8] sm:$0xff]  ;;  %v569_v4 = vpack.c.bf16 %v117_v0, %v115_v63  ;;  %v119_v6 = vld [vmem:[#allocation5 + $0x1a0] sm:$0xff] }
  0x56   :  { %606 = vmatpush1.bf16.msra.mxu1 %v605_v30  ;;  %v571_v5 = vpack.c.bf16 %v122_v3, %v120_v2  ;;  %v121_v7 = vld [vmem:[#allocation5 + $0x1b0] sm:$0xff]  ;;  %v124_v8 = vld [vmem:[#allocation5 + $0x1c8] sm:$0xff]  ;;  %v126_v9 = vld [vmem:[#allocation5 + $0x1d8] sm:$0xff] }
  0x57   :  { %550 = vmatpush1.bf16.msra.mxu0 %v549_v17  ;;  %608 = vmatprep.subr.bf16.mxu1 %v607_v32  ;;  %v573_v10 = vpack.c.bf16 %v121_v7, %v119_v6  ;;  %v575_v11 = vpack.c.bf16 %v126_v9, %v124_v8  ;;  %v123_v12 = vld [vmem:[#allocation5 + $0x1c0] sm:$0xff]  ;;  %v125_v13 = vld [vmem:[#allocation5 + $0x1d0] sm:$0xff]  ;;  %v128_v14 = vld [vmem:[#allocation5 + $0x1e8] sm:$0xff] }
  0x58   :  { %552 = vmatprep.subr.bf16.mxu0 %v551_v22  ;;  %v130_v15 = vld [vmem:[#allocation5 + $0x1f8] sm:$0xff]  ;;  %v577_v16 = vpack.c.bf16 %v125_v13, %v123_v12  ;;  %v127_v18 = vld [vmem:[#allocation5 + $0x1e0] sm:$0xff]  ;;  %v129_v19 = vld [vmem:[#allocation5 + $0x1f0] sm:$0xff] }
  0x59   :  { %v579_v17 = vpack.c.bf16 %v130_v15, %v128_v14  ;;  %v581_v20 = vpack.c.bf16 %v129_v19, %v127_v18  ;;  %v63_v21 = vld [vmem:[#allocation2] sm:$0xff]  ;;  %v372_v29 = vld [vmem:[#allocation7 + $0x80] sm:$0xff]  ;;  %v373_v30 = vld [vmem:[#allocation7 + $0x88] sm:$0xff] }
  0x5a   :  { %610 = vmatpush1.bf16.msra.mxu1 %v609_v42  ;;  %v615_v32 = vpack.c.bf16 %v373_v30, %v372_v29  ;;  %v357_v33 = vld [vmem:[#allocation7 + $0x8] sm:$0xff]  ;;  %v374_v34 = vld [vmem:[#allocation7 + $0x90] sm:$0xff]  ;;  %v375_v35 = vld [vmem:[#allocation7 + $0x98] sm:$0xff] }
  0x5b   :  { %554 = vmatpush1.bf16.msra.mxu0 %v553_v31  ;;  %612 = vmatprep.subr.bf16.mxu1 %v611_v44  ;;  %v356_v31 = vld [vmem:[#allocation7] sm:$0xff]  ;;  %v619_v37 = vpack.c.bf16 %v375_v35, %v374_v34  ;;  %v358_v38 = vld [vmem:[#allocation7 + $0x10] sm:$0xff]  ;;  %v359_v39 = vld [vmem:[#allocation7 + $0x18] sm:$0xff] }
  0x5c   :  { %556 = vmatprep.subr.bf16.mxu0 %v555_v36  ;;  %v617_v36 = vpack.c.bf16 %v357_v33, %v356_v31  ;;  %v376_v40 = vld [vmem:[#allocation7 + $0xa0] sm:$0xff]  ;;  %v377_v41 = vld [vmem:[#allocation7 + $0xa8] sm:$0xff]  ;;  %v621_v42 = vpack.c.bf16 %v359_v39, %v358_v38  ;;  %v379_v55 = vld [vmem:[#allocation7 + $0xb8] sm:$0xff] }
  0x5d   :  { %v360_v44 = vld [vmem:[#allocation7 + $0x20] sm:$0xff]  ;;  %v361_v45 = vld [vmem:[#allocation7 + $0x28] sm:$0xff]  ;;  %v363_v58 = vld [vmem:[#allocation7 + $0x38] sm:$0xff] }
  0x5e   :  { %614 = vmatpush1.bf16.msra.mxu1 %v613_v52  ;;  %v625_v46 = vpack.c.bf16 %v361_v45, %v360_v44  ;;  %v364_v63 = vld [vmem:[#allocation7 + $0x40] sm:$0xff]  ;;  %v365_v0 = vld [vmem:[#allocation7 + $0x48] sm:$0xff]  ;;  %v383_v3 = vld [vmem:[#allocation7 + $0xd8] sm:$0xff] }
  0x5f   :  { %558 = vmatpush1.bf16.msra.mxu0 %v557_v43  ;;  %272 = vmatprep.subr.mxu1 %v164_v57  ;;  %v623_v43 = vpack.c.bf16 %v377_v41, %v376_v40  ;;  %v362_v57 = vld [vmem:[#allocation7 + $0x30] sm:$0xff]  ;;  %v633_v2 = vpack.c.bf16 %v365_v0, %v364_v63  ;;  %v384_v7 = vld [vmem:[#allocation7 + $0xe0] sm:$0xff]  ;;  %v385_v8 = vld [vmem:[#allocation7 + $0xe8] sm:$0xff] }
  0x60   :  { %560 = vmatprep.subr.bf16.mxu0 %v559_v47  ;;  %v629_v59 = vpack.c.bf16 %v363_v58, %v362_v57  ;;  %v369_v12 = vld [vmem:[#allocation7 + $0x68] sm:$0xff]  ;;  %v386_v13 = vld [vmem:[#allocation7 + $0xf0] sm:$0xff]  ;;  %v387_v14 = vld [vmem:[#allocation7 + $0xf8] sm:$0xff] }
  0x61   :  { %v371_v18 = vld [vmem:[#allocation7 + $0x78] sm:$0xff]  ;;  %v483_v41 = vld [vmem:[%s859_s5] ss:$0 sm:$0xff] }
  0x62   :  { %273 = vmatpush1.msra.mxu1 %v163_v61  ;;  %v381_v61 = vld [vmem:[#allocation7 + $0xc8] sm:$0xff] }
  0x63   :  { %562 = vmatpush1.bf16.msra.mxu0 %v561_v53  ;;  %305 = vmatmul.mubr.f32.vlgmr.msra.gmra.mrb[0].mxu1 %v65_v1  ;;  %v382_v1 = vld [vmem:[#allocation7 + $0xd0] sm:$0xff] }
  0x64   :  { %564 = vmatprep.subr.bf16.mxu0 %v563_v54  ;;  %616 = vmatprep.subr.bf16.mxu1 %v615_v32  ;;  %v378_v54 = vld [vmem:[#allocation7 + $0xb0] sm:$0xff]  ;;  %v635_v6 = vpack.c.bf16 %v383_v3, %v382_v1 }
  0x65   :  { %618 = vmatpush3.bf16.msra.mxu1 %v617_v36  ;;  %v627_v56 = vpack.c.bf16 %v379_v55, %v378_v54 }
  0x66   :  { %620 = vmatprep.subr.bf16.mxu1 %v619_v37 }
  0x67   :  { %566 = vmatpush1.bf16.msra.mxu0 %v565_v60  ;;  %v380_v60 = vld [vmem:[#allocation7 + $0xc0] sm:$0xff] }
  0x68   :  { %568 = vmatprep.subr.bf16.mxu0 %v567_v62  ;;  %v631_v62 = vpack.c.bf16 %v381_v61, %v380_v60 }
  0x69   :  { %622 = vmatpush3.bf16.msra.mxu1 %v621_v42 }
  0x6a   :  { %624 = vmatprep.subr.bf16.mxu1 %v623_v43 }
  0x6b   :  { %570 = vmatpush1.bf16.msra.mxu0 %v569_v4  ;;  %v366_v4 = vld [vmem:[#allocation7 + $0x50] sm:$0xff] }
  0x6c   :  { %572 = vmatprep.subr.bf16.mxu0 %v571_v5  ;;  %v367_v5 = vld [vmem:[#allocation7 + $0x58] sm:$0xff] }
  0x6d   :  { %626 = vmatpush3.bf16.msra.mxu1 %v625_v46  ;;  %v637_v9 = vpack.c.bf16 %v367_v5, %v366_v4 }
  0x6e   :  { %628 = vmatprep.subr.bf16.mxu1 %v627_v56 }
  0x6f   :  { %574 = vmatpush1.bf16.msra.mxu0 %v573_v10  ;;  %v639_v10 = vpack.c.bf16 %v385_v8, %v384_v7 }
  0x70   :  { %576 = vmatprep.subr.bf16.mxu0 %v575_v11  ;;  %v368_v11 = vld [vmem:[#allocation7 + $0x60] sm:$0xff] }
  0x71   :  { %630 = vmatpush3.bf16.msra.mxu1 %v629_v59  ;;  %v641_v15 = vpack.c.bf16 %v369_v12, %v368_v11 }
  0x72   :  { %632 = vmatprep.subr.bf16.mxu1 %v631_v62 }
  0x73   :  { %578 = vmatpush1.bf16.msra.mxu0 %v577_v16  ;;  %v643_v16 = vpack.c.bf16 %v387_v14, %v386_v13 }
  0x74   :  { %580 = vmatprep.subr.bf16.mxu0 %v579_v17  ;;  %v370_v17 = vld [vmem:[#allocation7 + $0x70] sm:$0xff] }
  0x75   :  { %634 = vmatpush3.bf16.msra.mxu1 %v633_v2  ;;  %v645_v19 = vpack.c.bf16 %v371_v18, %v370_v17 }
  0x76   :  { %636 = vmatprep.subr.bf16.mxu1 %v635_v6 }
  0x77   :  { %582 = vmatpush1.bf16.msra.mxu0 %v581_v20 }
  0x79   :  { %638 = vmatpush3.bf16.msra.mxu1 %v637_v9 }
  0x7a   :  { %234 = vmatmul.mubr.f32.vlgmr.msra.gmra.mrb[0].mxu0 %v63_v21  ;;  %640 = vmatprep.subr.bf16.mxu1 %v639_v10 }
  0x7d   :  { %642 = vmatpush3.bf16.msra.mxu1 %v641_v15 }
  0x7e   :  { %644 = vmatprep.subr.bf16.mxu1 %v643_v16 }
  0x81   :  { %646 = vmatpush3.bf16.msra.mxu1 %v645_v19 }
 0x136   :  { %v306_v22 = vpop.f32.mrb[0].mxu1 }
 0x137   :  { %v308_v23 = vpop.f32.mrb[1].mxu1 }
 0x14d   :  { %v235_v24 = vpop.f32.mrb[0].mxu0 }
 0x14e   :  { %v307_v25 = vadd.f32 %v306_v22, %v235_v24  ;;  %v237_v26 = vpop.f32.mrb[1].mxu0  ;;  %v330_v22 = vlaneseq }
 0x14f   :  { %v309_v27 = vadd.f32 %v308_v23, %v237_v26 }
 0x150   :  { %v331_v24 = vshrl.u32 %v330_v22, 7 }
 0x151   :  { %v311_v28 = vadd.f32 %v309_v27, %v307_v25 }
 0x152   :  { %v336_v26 = vsub.s32 1, %v331_v24 }
 0x153   :  { %312 = vadd.xlane.f32.xlu0 %v311_v28  ;;  %v342_v28 = vld [vmem:[%s857_s3] sm:$0x3]  ;;  %s760_s3 = smov [#allocation8]  }
 0x154   :  { %v351_v34 = vrot.slane %v342_v28, %v336_v26  ;;  %s472_s15 = sshll.u32 %s760_s3, 4  ;;  %s473_s15 = int_to_ptr.vmem [resolvable:$true] %s472_s15 }
 0x155   :  { %s725_s16 = scalar_lea.vmem %s473_s15, 128  ;;  %p730_p11 = scmp.lt.s32.totalorder %s473_s15, %s473_s15 }
 0x156   :  { %p726_p10 = scmp.ne.s32.totalorder %s473_s15, %s725_s16  ;;  %p731_p12 = scmp.lt.s32.totalorder %s725_s16, %s725_s16 }
 0x158   :  { %p732_p13 = por %p731_p12, %p730_p11 }
 0x15a   :  { %p733_p0 = pnand %p732_p13, %p726_p10 }
 0x1e0   :  { %v313_v47 = vpop.xlane.xlu0 %312 }
 0x1e1   :  { %v315_v48 = vmul.f32 0.00390625, %v313_v47 }
 0x1e3   :  { %v316_v49 = vsub.f32 %v307_v25, %v315_v48  ;;  %v317_v50 = vsub.f32 %v309_v27, %v315_v48  ;;  %v332_v25 = vsub.s32 0, %v331_v24  ;;  %v328_v27 = vld [vmem:[%s856_s2] sm:$0x3] }
 0x1e4   :  { %v337_v30 = vrot.slane %v328_v27, %v336_v26 }
 0x1e5   :  { %v318_v51 = vmul.f32 %v316_v49, %v316_v49  ;;  %v319_v52 = vmul.f32 %v317_v50, %v317_v50  ;;  %v333_v29 = vrot.slane %v328_v27, %v332_v25  ;;  %v347_v33 = vrot.slane %v342_v28, %v332_v25 }
 0x1e7   :  { %v320_v53 = vadd.f32 %v319_v52, %v318_v51 }
 0x1e9   :  { %321 = vadd.xlane.f32.xlu0 %v320_v53 }
 0x276   :  { %v322_v20 = vpop.xlane.xlu0 %321 }
 0x277   :  { %v323_v21 = vmul.f32 0.00390625, %v322_v20 }
 0x279   :  { %v324_v23 = vadd.f32 1e-05, %v323_v21 }
 0x27b   :  { %657 = vrsqrt.f32 %v324_v23 }
 0x285   :  { %v658_v31 = vpop.eup %657 }
 0x286   :  { %v327_v32 = vmul.f32 %v658_v31, %v317_v50  ;;  %v326_v35 = vmul.f32 %v658_v31, %v316_v49 }
 0x288   :  { %v341_v36 = vmul.f32 %v337_v30, %v327_v32  ;;  %v340_v37 = vmul.f32 %v333_v29, %v326_v35 }
 0x28a   :  { %v355_v38 = vadd.f32 %v351_v34, %v341_v36  ;;  %v354_v39 = vadd.f32 %v347_v33, %v340_v37 }
 0x28c   :  { %459 = vmatprep.mubr.f32.mxu1 %v355_v38 }
 0x28d   :  { %460 = vmatmul.mubr.f32.vlgmr.msra.gmra.mrb[2].mxu1 %v354_v39 }
 0x360   :  { %v516_v40 = vpop.f32.mrb[2].mxu1 }
 0x361   :  { %v517_v42 = vpop.f32.mrb[3].mxu1 }
 0x362   :  { %v518_v43 = vadd.f32 %v517_v42, %v516_v40 }
 0x364   :  { %v462_v44 = vadd.f32 %v518_v43, %v483_v41 }
 0x366   :  { %465 = vst [vmem:[#allocation8] sm:$0xff] %v462_v44 }
 0x367   :  { %736 = shalt.err (!%p733_p0)
}
 0x368   :  { %s737_s19 = scalar_lea.hbm %s860_s6, 128 }
 0x369   :  { %p738_p1 = scmp.ne.s32.totalorder %s860_s6, %s737_s19  ;;  %p741_p2 = scmp.lt.u32.totalorder %s737_s19, %s860_s6 }
 0x36b   :  { %p743_p3 = pnand %p741_p2, %p738_p1 }
 0x36d   :  { %746 = shalt.err (!%p743_p3)
}
 0x36e   :  { %475 = dma.vmem_to_hbm [thread:$0]  %s473_s15, 128, %s860_s6, [#allocation4]  }
 0x36f   :  { %751 = dma.done.wait [#allocation4], 128  }
 0x370   :  { %752 = vsyncadd [#allocation4], 4294967168 }
 0x371   :  { %479 = vsyncpa [#allocation3], 1 }
 0x372   :  { %480 = vsyncpa [#allocation6], 1 }
 0x373   :  { %481 = vsyncpa [#allocation4], 1 }

</bundles_post_ra>
